<compile_context>
chip_gen: v5e
topology: v5e:2x2
jax: 0.10.0
libtpu: 0.0.40
codegen_flags: <defaults>
</compile_context>

<pallas_src>
import functools

import jax
import jax.numpy as jnp
from jax.experimental import pallas as pl
from jax.experimental.pallas import tpu as pltpu


def news_encoder_kernel(len_ref, x_ref, cw_ref, cb_ref, aw_ref, ab_ref, aq_ref,
                        out_ref, *, seq_len, window):
    """One batch tile (TB news items) per grid step.

    len_ref : (TB, 1)   int32   actual (non-padding) token count per item
    x_ref   : (TB, Lp, E) bf16  embedded text, zero rows at both sequence ends
                                (Lp = L + window - 1)
    cw_ref  : (W*E, F)  bf16    im2col conv weight, cw[o*E+e, f] = torch_w[f, e, o]
    cb_ref  : (1, F)    f32     conv bias
    aw_ref  : (F, Q)    bf16    attention Linear weight (transposed torch Linear)
    ab_ref  : (1, Q)    f32     attention Linear bias
    aq_ref  : (Q, 1)    f32     attention query vector
    out_ref : (TB, F)   f32     final text vectors for this batch tile
    """
    L, W = seq_len, window
    TB, Lp, E = x_ref.shape
    F = out_ref.shape[1]

    # Load once; do the im2col slicing/concat in f32 (unpacked sublane layout,
    # so the o:o+L window slices never straddle a packed bf16 sublane pair),
    # then hand bf16 operands to the MXU. The up/down casts are cheap VPU work
    # and the HBM stream stays bf16.
    xp = x_ref[...].astype(jnp.float32)                        # (TB, Lp, E)

    # --- Conv1d('same') as ONE deep-K MXU matmul (im2col over the W offsets) ---
    x_unf = jnp.concatenate([xp[:, o:o + L, :] for o in range(W)], axis=2)
    x2 = x_unf.reshape(TB * L, W * E).astype(jnp.bfloat16)
    h = jnp.dot(x2, cw_ref[...], preferred_element_type=jnp.float32) + cb_ref[...]
    h = jnp.maximum(h, 0.0)                                    # (TB*L, F) f32
    # F.dropout(..., training=False) == identity  # TODO(synk): training-mode dropout not implemented

    # --- Additive attention with length masking ---
    temp = jnp.tanh(jnp.dot(h.astype(jnp.bfloat16), aw_ref[...],
                            preferred_element_type=jnp.float32) + ab_ref[...])
    scores = jnp.dot(temp, aq_ref[...],
                     preferred_element_type=jnp.float32)       # (TB*L, 1)
    scores = scores.reshape(TB, L, 1)

    # Mask built in-kernel from the (TB, 1) int32 lengths (no HBM mask array).
    pos = jax.lax.broadcasted_iota(jnp.int32, (TB, L, 1), 1)
    valid = pos < len_ref[...][:, :, None]                     # (TB, L, 1)
    scores = jnp.where(valid, scores, jnp.float32(-1e30))

    m = jnp.max(scores, axis=1, keepdims=True)                 # (TB, 1, 1)
    e = jnp.exp(scores - m)                                    # (TB, L, 1)
    # Unnormalized weighted sum, then one normalization on the (TB, F) slab
    # (saves a broadcasted multiply over the full (TB, L, F) tile).
    acc = jnp.sum(e * h.reshape(TB, L, F), axis=1)             # (TB, F)
    inv = pl.reciprocal(jnp.sum(e, axis=1), approx=True)       # (TB, 1)
    out_ref[...] = acc * inv


@functools.partial(jax.jit, static_argnames=("block_b",))
def news_encoder_forward(text, word_emb, conv_w_pt, conv_b, lin_w_pt, lin_b,
                         query, *, block_b=128):
    """JAX glue (embedding gather, parameter re-layout) + Pallas hot path."""
    B, L = text.shape
    V, E = word_emb.shape
    F, _, W = conv_w_pt.shape
    Q = lin_w_pt.shape[0]
    pad = (W - 1) // 2
    Lp = L + 2 * pad

    TB = min(block_b, B)
    B_pad = ((B + TB - 1) // TB) * TB

    # Fold the conv 'same' zero padding into the gather: one extra all-zero
    # vocab row (id = V) fills the W-1 boundary positions, so the gather writes
    # the padded bf16 embedding stream directly (no second jnp.pad copy).
    emb_table = jnp.concatenate(
        [word_emb.astype(jnp.bfloat16), jnp.zeros((1, E), jnp.bfloat16)], axis=0)
    text_pad = jnp.pad(text, ((0, B_pad - B), (pad, pad)), constant_values=V)
    x = jnp.take(emb_table, text_pad, axis=0)                  # (B_pad, Lp, E) bf16

    lengths = jnp.sum((text != 0).astype(jnp.int32), axis=1)   # (B,)
    lengths = jnp.pad(lengths, (0, B_pad - B)).reshape(B_pad, 1)

    # Re-layout the PyTorch parameters for the kernel.
    cw_k = jnp.transpose(conv_w_pt, (2, 1, 0)).reshape(W * E, F).astype(jnp.bfloat16)
    cb_k = conv_b.reshape(1, F).astype(jnp.float32)
    aw_k = lin_w_pt.T.astype(jnp.bfloat16)                     # (F, Q)
    ab_k = lin_b.reshape(1, Q).astype(jnp.float32)
    aq_k = query.reshape(Q, 1).astype(jnp.float32)

    kernel = functools.partial(news_encoder_kernel, seq_len=L, window=W)

    out = pl.pallas_call(
        kernel,
        out_shape=jax.ShapeDtypeStruct((B_pad, F), jnp.float32),
        grid=(B_pad // TB,),
        in_specs=[
            pl.BlockSpec((TB, 1), lambda b: (b, 0)),           # lengths
            pl.BlockSpec((TB, Lp, E), lambda b: (b, 0, 0)),    # embedded text
            pl.BlockSpec((W * E, F), lambda b: (0, 0)),        # conv weight (im2col)
            pl.BlockSpec((1, F), lambda b: (0, 0)),            # conv bias
            pl.BlockSpec((F, Q), lambda b: (0, 0)),            # attention Linear W
            pl.BlockSpec((1, Q), lambda b: (0, 0)),            # attention Linear b
            pl.BlockSpec((Q, 1), lambda b: (0, 0)),            # attention query
        ],
        out_specs=pl.BlockSpec((TB, F), lambda b: (b, 0)),     # lane-dense slab
        compiler_params=pltpu.CompilerParams(
            dimension_semantics=("parallel",)),
    )(lengths, x, cw_k, cb_k, aw_k, ab_k, aq_k)

    return out[:B]


def reference_forward(text, word_emb, conv_w_pt, conv_b, lin_w_pt, lin_b, query,
                      matmul_dtype=jnp.float32):
    """Pure-JAX reference mirroring the PyTorch math (eval mode).

    matmul_dtype=bfloat16 reproduces the kernel's mixed precision (bf16 MXU
    inputs, f32 accumulation and element-wise math).
    """
    B, L = text.shape
    F, E, W = conv_w_pt.shape
    pad = (W - 1) // 2
    emb = jnp.take(word_emb, text, axis=0).astype(matmul_dtype)       # (B, L, E)
    xp = jnp.pad(emb, ((0, 0), (pad, pad), (0, 0)))
    cw = jnp.transpose(conv_w_pt, (2, 1, 0)).astype(matmul_dtype)     # (W, E, F)
    conv = jnp.zeros((B, L, F), jnp.float32)
    for o in range(W):
        conv = conv + jnp.einsum('ble,ef->blf', xp[:, o:o + L], cw[o],
                                 preferred_element_type=jnp.float32)
    h = jnp.maximum(conv + conv_b[None, None, :].astype(jnp.float32), 0.0)
    aw = lin_w_pt.T.astype(matmul_dtype)                              # (F, Q)
    temp = jnp.tanh(jnp.einsum('blf,fq->blq', h.astype(matmul_dtype), aw,
                               preferred_element_type=jnp.float32)
                    + lin_b[None, None, :].astype(jnp.float32))
    scores = jnp.einsum('blq,q->bl', temp, query.astype(jnp.float32),
                        preferred_element_type=jnp.float32)
    lengths = jnp.sum((text != 0).astype(jnp.int32), axis=1)
    msk = jnp.arange(L)[None, :] < lengths[:, None]
    scores = jnp.where(msk, scores, -1e30)
    wts = jax.nn.softmax(scores, axis=1)
    return jnp.einsum('bl,blf->bf', wts, h)


if __name__ == "__main__":
    # Small config consistent with the module's __init__.
    B = 2          # batch of news
    L = 16         # num_words_title (sequence length)
    V = 50         # vocab size
    E = 32         # word_embedding_dim
    F = 32         # num_filters
    W = 3          # window_size
    Q = 16         # query_vector_dim

    key = jax.random.PRNGKey(0)
    k_emb, k_cw, k_cb, k_lw, k_lb, k_q, k_txt = jax.random.split(key, 7)

    word_emb = jax.random.normal(k_emb, (V, E), jnp.float32) * 0.1
    word_emb = word_emb.at[0].set(0.0)   # pretrained row for padding_idx=0

    conv_w_pt = jax.random.normal(k_cw, (F, E, W), jnp.float32) * 0.05
    conv_b = jax.random.normal(k_cb, (F,), jnp.float32) * 0.05
    lin_w_pt = jax.random.normal(k_lw, (Q, F), jnp.float32) * 0.05
    lin_b = jax.random.normal(k_lb, (Q,), jnp.float32) * 0.05
    query = jax.random.uniform(k_q, (Q,), jnp.float32, minval=-0.1, maxval=0.1)

    # news['title']: int ids in [1, V), with trailing padding zeros per row.
    text = jax.random.randint(k_txt, (B, L), 1, V, dtype=jnp.int32)
    true_lens = jnp.array([L - 4, L - 9], dtype=jnp.int32)
    text = jnp.where(jnp.arange(L)[None, :] < true_lens[:, None], text, 0)

    out = news_encoder_forward(text, word_emb, conv_w_pt, conv_b,
                               lin_w_pt, lin_b, query)
    out = jax.block_until_ready(out)
    assert out.shape == (B, F)

    # Tight check vs a matched-precision reference (same bf16 MXU inputs).
    ref_bf16 = reference_forward(text, word_emb, conv_w_pt, conv_b,
                                 lin_w_pt, lin_b, query,
                                 matmul_dtype=jnp.bfloat16)
    err = jnp.max(jnp.abs(out - ref_bf16))
    assert jnp.allclose(out, ref_bf16, atol=2e-3, rtol=2e-3), (
        f"mismatch vs bf16-matched ref: max abs err = {err}")

    # Loose sanity check vs the pure-f32 PyTorch-faithful math.
    ref_f32 = reference_forward(text, word_emb, conv_w_pt, conv_b,
                                lin_w_pt, lin_b, query,
                                matmul_dtype=jnp.float32)
    err32 = jnp.max(jnp.abs(out - ref_f32))
    assert jnp.allclose(out, ref_f32, atol=1e-2, rtol=1e-2), (
        f"mismatch vs f32 ref: max abs err = {err32}")

    print("KERNEL_OK")
</pallas_src>

<mosaic_0001>
module attributes {stable_mosaic.version = 11 : i64} {
  func.func @news_encoder_kernel(%arg0: i32, %arg1: memref<2x1xi32, #tpu.memory_space<vmem>>, %arg2: memref<2x18x32xbf16, #tpu.memory_space<vmem>>, %arg3: memref<96x32xbf16, #tpu.memory_space<vmem>>, %arg4: memref<1x32xf32, #tpu.memory_space<vmem>>, %arg5: memref<32x16xbf16, #tpu.memory_space<vmem>>, %arg6: memref<1x16xf32, #tpu.memory_space<vmem>>, %arg7: memref<16x1xf32, #tpu.memory_space<vmem>>, %arg8: memref<2x32xf32, #tpu.memory_space<vmem>>) attributes {dimension_semantics = [#tpu.dimension_semantics<parallel>], iteration_bounds = array<i64: 1>, scalar_prefetch = 0 : i64, scratch_operands = 0 : i64, tpu.core_type = #tpu.core_type<tc>, window_params = [{transform_indices = @transform_0, window_bounds = array<i64: 2, 1>}, {transform_indices = @transform_1, window_bounds = array<i64: 2, 18, 32>}, {pipeline_mode = #tpu.pipeline_mode<synchronous>, transform_indices = @transform_2, window_bounds = array<i64: 96, 32>}, {pipeline_mode = #tpu.pipeline_mode<synchronous>, transform_indices = @transform_3, window_bounds = array<i64: 1, 32>}, {pipeline_mode = #tpu.pipeline_mode<synchronous>, transform_indices = @transform_4, window_bounds = array<i64: 32, 16>}, {pipeline_mode = #tpu.pipeline_mode<synchronous>, transform_indices = @transform_5, window_bounds = array<i64: 1, 16>}, {pipeline_mode = #tpu.pipeline_mode<synchronous>, transform_indices = @transform_6, window_bounds = array<i64: 16, 1>}, {transform_indices = @transform_7, window_bounds = array<i64: 2, 32>}]} {
    %c0 = arith.constant 0 : index
    %c0_0 = arith.constant 0 : index
    %c0_1 = arith.constant 0 : index
    %0 = vector.load %arg2[%c0, %c0_0, %c0_1] : memref<2x18x32xbf16, #tpu.memory_space<vmem>>, vector<2x18x32xbf16>
    %1 = arith.extf %0 : vector<2x18x32xbf16> to vector<2x18x32xf32>
    %2 = vector.extract_strided_slice %1 {offsets = [0, 0, 0], sizes = [2, 16, 32], strides = [1, 1, 1]} : vector<2x18x32xf32> to vector<2x16x32xf32>
    %3 = vector.extract_strided_slice %1 {offsets = [0, 1, 0], sizes = [2, 16, 32], strides = [1, 1, 1]} : vector<2x18x32xf32> to vector<2x16x32xf32>
    %4 = vector.extract_strided_slice %1 {offsets = [0, 2, 0], sizes = [2, 16, 32], strides = [1, 1, 1]} : vector<2x18x32xf32> to vector<2x16x32xf32>
    %5 = tpu.concatenate %2, %3, %4 in 2 : vector<2x16x32xf32>, vector<2x16x32xf32>, vector<2x16x32xf32> -> vector<2x16x96xf32>
    %6 = vector.shape_cast %5 : vector<2x16x96xf32> to vector<32x96xf32>
    %7 = arith.truncf %6 : vector<32x96xf32> to vector<32x96xbf16>
    %c0_2 = arith.constant 0 : index
    %c0_3 = arith.constant 0 : index
    %8 = vector.load %arg3[%c0_2, %c0_3] : memref<96x32xbf16, #tpu.memory_space<vmem>>, vector<96x32xbf16>
    %cst = arith.constant dense<0.000000e+00> : vector<32x32xf32>
    %9 = tpu.matmul %7, %8, %cst {dimension_numbers = #tpu.dot_dimension_numbers<[1], [0], [0], [1], [0, 0, 1, 1], [], []>} : vector<32x96xbf16>, vector<96x32xbf16>, vector<32x32xf32> -> vector<32x32xf32>
    %c0_4 = arith.constant 0 : index
    %c0_5 = arith.constant 0 : index
    %10 = vector.load %arg4[%c0_4, %c0_5] : memref<1x32xf32, #tpu.memory_space<vmem>>, vector<1x32xf32>
    %11 = vector.broadcast %10 : vector<1x32xf32> to vector<32x32xf32>
    %12 = arith.addf %9, %11 : vector<32x32xf32>
    %cst_6 = arith.constant 0.000000e+00 : f32
    %13 = vector.broadcast %cst_6 : f32 to vector<32x32xf32>
    %14 = arith.maximumf %12, %13 : vector<32x32xf32>
    %15 = arith.truncf %14 : vector<32x32xf32> to vector<32x32xbf16>
    %c0_7 = arith.constant 0 : index
    %c0_8 = arith.constant 0 : index
    %16 = vector.load %arg5[%c0_7, %c0_8] : memref<32x16xbf16, #tpu.memory_space<vmem>>, vector<32x16xbf16>
    %cst_9 = arith.constant dense<0.000000e+00> : vector<32x16xf32>
    %17 = tpu.matmul %15, %16, %cst_9 {dimension_numbers = #tpu.dot_dimension_numbers<[1], [0], [0], [1], [0, 0, 1, 1], [], []>} : vector<32x32xbf16>, vector<32x16xbf16>, vector<32x16xf32> -> vector<32x16xf32>
    %c0_10 = arith.constant 0 : index
    %c0_11 = arith.constant 0 : index
    %18 = vector.load %arg6[%c0_10, %c0_11] : memref<1x16xf32, #tpu.memory_space<vmem>>, vector<1x16xf32>
    %19 = vector.broadcast %18 : vector<1x16xf32> to vector<32x16xf32>
    %20 = arith.addf %17, %19 : vector<32x16xf32>
    %21 = math.tanh %20 : vector<32x16xf32>
    %c0_12 = arith.constant 0 : index
    %c0_13 = arith.constant 0 : index
    %22 = vector.load %arg7[%c0_12, %c0_13] : memref<16x1xf32, #tpu.memory_space<vmem>>, vector<16x1xf32>
    %cst_14 = arith.constant dense<0.000000e+00> : vector<32x1xf32>
    %23 = tpu.matmul %21, %22, %cst_14 {dimension_numbers = #tpu.dot_dimension_numbers<[1], [0], [0], [1], [0, 0, 1, 1], [], []>} : vector<32x16xf32>, vector<16x1xf32>, vector<32x1xf32> -> vector<32x1xf32>
    %24 = vector.shape_cast %23 : vector<32x1xf32> to vector<2x16x1xf32>
    %25 = tpu.iota {dimensions = array<i32: 1>} : vector<2x16x1xi32>
    %c0_15 = arith.constant 0 : index
    %c0_16 = arith.constant 0 : index
    %26 = vector.load %arg1[%c0_15, %c0_16] : memref<2x1xi32, #tpu.memory_space<vmem>>, vector<2x1xi32>
    %27 = vector.shape_cast %26 : vector<2x1xi32> to vector<2x1x1xi32>
    %28 = vector.broadcast %27 : vector<2x1x1xi32> to vector<2x16x1xi32>
    %29 = arith.cmpi slt, %25, %28 : vector<2x16x1xi32>
    %cst_17 = arith.constant -1.000000e+30 : f32
    %30 = vector.broadcast %cst_17 : f32 to vector<2x16x1xf32>
    %31 = arith.select %29, %24, %30 : vector<2x16x1xi1>, vector<2x16x1xf32>
    %cst_18 = arith.constant dense<0xFF800000> : vector<2x1xf32>
    %32 = vector.multi_reduction <maximumf>, %31, %cst_18 [1] : vector<2x16x1xf32> to vector<2x1xf32>
    %33 = vector.shape_cast %32 : vector<2x1xf32> to vector<2x1x1xf32>
    %34 = vector.broadcast %33 : vector<2x1x1xf32> to vector<2x16x1xf32>
    %35 = arith.subf %31, %34 : vector<2x16x1xf32>
    %36 = math.exp %35 : vector<2x16x1xf32>
    %37 = vector.shape_cast %14 : vector<32x32xf32> to vector<2x16x32xf32>
    %38 = vector.broadcast %36 : vector<2x16x1xf32> to vector<2x16x32xf32>
    %39 = arith.mulf %38, %37 : vector<2x16x32xf32>
    %cst_19 = arith.constant dense<0.000000e+00> : vector<2x32xf32>
    %40 = vector.multi_reduction <add>, %39, %cst_19 [1] : vector<2x16x32xf32> to vector<2x32xf32>
    %cst_20 = arith.constant dense<0.000000e+00> : vector<2x1xf32>
    %41 = vector.multi_reduction <add>, %36, %cst_20 [1] : vector<2x16x1xf32> to vector<2x1xf32>
    %42 = tpu.reciprocal %41 {approx = true} : vector<2x1xf32> -> vector<2x1xf32>
    %43 = vector.broadcast %42 : vector<2x1xf32> to vector<2x32xf32>
    %44 = arith.mulf %40, %43 : vector<2x32xf32>
    %c0_21 = arith.constant 0 : index
    %c0_22 = arith.constant 0 : index
    %45 = vector.load %arg8[%c0_21, %c0_22] : memref<2x32xf32, #tpu.memory_space<vmem>>, vector<2x32xf32>
    tpu.vector_store %arg8[%c0_21, %c0_22], %44 {strides = array<i32>} : memref<2x32xf32, #tpu.memory_space<vmem>>, vector<2x32xf32>,
    return
  }
  func.func @transform_0(%arg0: i32) -> (i32, i32) {
    %c0_i32 = arith.constant 0 : i32
    %c0_i32_0 = arith.constant 0 : i32
    return %arg0, %c0_i32 : i32, i32
  }
  func.func @transform_1(%arg0: i32) -> (i32, i32, i32) {
    %c0_i32 = arith.constant 0 : i32
    %c0_i32_0 = arith.constant 0 : i32
    %c0_i32_1 = arith.constant 0 : i32
    return %arg0, %c0_i32, %c0_i32_0 : i32, i32, i32
  }
  func.func @transform_2(%arg0: i32) -> (i32, i32) {
    %c0_i32 = arith.constant 0 : i32
    %c0_i32_0 = arith.constant 0 : i32
    %c0_i32_1 = arith.constant 0 : i32
    return %c0_i32, %c0_i32_0 : i32, i32
  }
  func.func @transform_3(%arg0: i32) -> (i32, i32) {
    %c0_i32 = arith.constant 0 : i32
    %c0_i32_0 = arith.constant 0 : i32
    %c0_i32_1 = arith.constant 0 : i32
    return %c0_i32, %c0_i32_0 : i32, i32
  }
  func.func @transform_4(%arg0: i32) -> (i32, i32) {
    %c0_i32 = arith.constant 0 : i32
    %c0_i32_0 = arith.constant 0 : i32
    %c0_i32_1 = arith.constant 0 : i32
    return %c0_i32, %c0_i32_0 : i32, i32
  }
  func.func @transform_5(%arg0: i32) -> (i32, i32) {
    %c0_i32 = arith.constant 0 : i32
    %c0_i32_0 = arith.constant 0 : i32
    %c0_i32_1 = arith.constant 0 : i32
    return %c0_i32, %c0_i32_0 : i32, i32
  }
  func.func @transform_6(%arg0: i32) -> (i32, i32) {
    %c0_i32 = arith.constant 0 : i32
    %c0_i32_0 = arith.constant 0 : i32
    %c0_i32_1 = arith.constant 0 : i32
    return %c0_i32, %c0_i32_0 : i32, i32
  }
  func.func @transform_7(%arg0: i32) -> (i32, i32) {
    %c0_i32 = arith.constant 0 : i32
    %c0_i32_0 = arith.constant 0 : i32
    return %arg0, %c0_i32 : i32, i32
  }
}

</mosaic_0001>

<bundles_post_ra>
// kernel: news_encoder_forward.1
= control target key start
LH: loop header
LB: loop body
LE: loop exit
PB: predicated region body
PF: predicated region fallthrough
CT: control target
= control target key end

     0   :  { %vm46_vm0 = vcmask 1046528   ;;  %vm69_vm1 = vcmask 1045504   ;;  %s733_s0 = inlined_call_operand.vmem [shape: s32[2,1], index: 0, kind: input, shape index: {}]   ;;  %s734_s1 = inlined_call_operand.vmem [shape: bf16[2,18,32], index: 1, kind: input, shape index: {}]   ;;  %s735_s2 = inlined_call_operand.vmem [shape: bf16[96,32], index: 2, kind: input, shape index: {}]   ;;  %s736_s3 = inlined_call_operand.vmem [shape: f32[1,32], index: 3, kind: input, shape index: {}]   ;;  %s737_s4 = inlined_call_operand.vmem [shape: bf16[32,16], index: 4, kind: input, shape index: {}]   ;;  %s738_s5 = inlined_call_operand.vmem [shape: f32[1,16], index: 5, kind: input, shape index: {}]   ;;  %s739_s6 = inlined_call_operand.vmem [shape: f32[16,1], index: 6, kind: input, shape index: {}]   ;;  %s740_s7 = inlined_call_operand.hbm [shape: f32[2,32], index: 7, kind: output, shape index: {}]  }
   0x1   :  { %v31_v0 = vld [vmem:[%s734_s1 + $0xc] sm:$0xff]   ;;  %v33_v1 = vld [vmem:[%s734_s1 + $0x14] sm:$0x1]  ;;  %v473_v2 = vld [vmem:[%s734_s1] sm:$0xff]  }
   0x2   :  { %v610_v3 = vunpack.c.l.bf16 %v31_v0  ;;  %v612_v4 = vunpack.c.h.bf16 %v31_v0  ;;  %v39_v5 = vunpack.c.l.bf16 %v33_v1  ;;  %v614_v6 = vunpack.c.l.bf16 %v473_v2  ;;  %v30_v7 = vld [vmem:[%s734_s1 + $0x8] sm:$0x1]  ;;  %v468_v11 = vld [vmem:[%s735_s2 + $0x20] sm:$0xff] }
   0x3   :  { %v469_v8 = vld [vmem:[%s735_s2 + $0x28] sm:$0xff]  ;;  %v622_v9 = vunpack.c.h.bf16 %v473_v2  ;;  %v36_v10 = vunpack.c.l.bf16 %v30_v7 }
   0x4   :  { %v52_v12 = vrot.slane %v610_v3, 1  ;;  %v53_v13 = vrot.slane %v612_v4, 1  ;;  %v55_v14 = vrot.slane %v39_v5, 1  ;;  %v47_v15 = vrot.slane %v614_v6, 1  ;;  %165 = vmatpush.bf16.msra.mxu0 %v469_v8  ;;  %476 = vmatpush.bf16.msra.mxu3 %v469_v8 }
   0x5   :  { %v48_v16 = vrot.slane %v622_v9, 1  ;;  %v50_v17 = vrot.slane %v36_v10, 1  ;;  %v75_v18 = vrot.slane %v610_v3, 2 }
   0x6   :  { %12 = vsyncpa [#allocation3], 0  ;;  %v54_v19 = vsel %vm46_vm0, %v52_v12, %v53_v13  ;;  %v56_v20 = vsel %vm46_vm0, %v53_v13, %v55_v14  ;;  %v76_v21 = vrot.slane %v612_v4, 2  ;;  %v78_v22 = vrot.slane %v39_v5, 2  ;;  %v467_v30 = vld [vmem:[%s735_s2 + $0x18] sm:$0xff]  ;;  %s557_s14 = smov 32  }
   0x7   :  { %v496_v23 = vpack.i.bf16 %v56_v20, %v54_v19  ;;  %v49_v24 = vsel %vm46_vm0, %v47_v15, %v48_v16  ;;  %v51_v25 = vsel %vm46_vm0, %v48_v16, %v50_v17  ;;  %v70_v26 = vrot.slane %v614_v6, 2  ;;  %s558_s15 = smov 64   ;;  %v466_v37 = vld [vmem:[%s735_s2 + $0x10] sm:$0xff]  ;;  %v465_v38 = vld [vmem:[%s735_s2 + $0x8] sm:$0xff]  ;;  %v464_v39 = vld [vmem:[%s735_s2] sm:$0xff]  ;;  %s415_s11 = sshll.u32 %s740_s7, 4  ;;  %s416_s11 = int_to_ptr.hbm [resolvable:$true] %s415_s11 }
   0x8   :  { %v486_v27 = vpack.i.bf16 %v51_v25, %v49_v24  ;;  %v71_v28 = vrot.slane %v622_v9, 2  ;;  %v73_v29 = vrot.slane %v36_v10, 2  ;;  %166 = vmatpush.bf16.msra.mxu0 %v468_v11  ;;  %477 = vmatpush.bf16.msra.mxu3 %v468_v11  ;;  %v77_v31 = vsel %vm69_vm1, %v75_v18, %v76_v21  ;;  %v471_v62 = vld [vmem:[%s737_s4 + $0x8] sm:$0xff]  ;;  %v470_v63 = vld [vmem:[%s737_s4] sm:$0xff] }
   0x9   :  { %497 = vrot.lane.b32.xlu1 %v496_v23, %s557_s14  ;;  %v79_v32 = vsel %vm69_vm1, %v76_v21, %v78_v22  ;;  %vm92_vm2 = vcmask 261120   ;;  %vm97_vm3 = vcmask 523264   ;;  %vm156_vm4 = vcmask 785408   ;;  %220 = vmatpush.bf16.msra.mxu1 %v471_v62  ;;  %v509_v1 = vld [vmem:[%s736_s3] ss:$0 sm:$0xff]  ;;  %v238_v15 = vld [vmem:[%s739_s6 + $0x8] sm:$0xff] }
   0xa   :  { %487 = vrot.lane.b32.xlu0 %v486_v27, %s557_s14  ;;  %v72_v33 = vsel %vm69_vm1, %v70_v26, %v71_v28  ;;  %v74_v34 = vsel %vm69_vm1, %v71_v28, %v73_v29  ;;  %v501_v35 = vpack.i.bf16 %v79_v32, %v77_v31  ;;  %266 = vmatpush.msra.mxu2 %v238_v15  ;;  %v237_v16 = vld [vmem:[%s739_s6] sm:$0xff]  ;;  %vm239_vm5 = vcmask 130048  }
   0xb   :  { %v491_v36 = vpack.i.bf16 %v74_v34, %v72_v33  ;;  %v510_v17 = vld [vmem:[%s738_s5] ss:$0 sm:$0xff]  ;;  %vm296_vm8 = vcmask 7168   ;;  %vm403_vm11 = vcmask 1041409   ;;  %vm406_vm12 = vcmask 254976  }
   0xc   :  { %167 = vmatpush.bf16.msra.mxu0 %v467_v30  ;;  %478 = vmatpush.bf16.msra.mxu3 %v467_v30  ;;  %v281_v30 = vlaneseq  ;;  %v284_v31 = vld [vmem:[%s733_s0] sm:$0x3]  ;;  %s560_s0 = smov [#allocation2]  }
   0xd   :  { %221 = vmatpush.bf16.msra.mxu1 %v470_v63  ;;  %267 = vmatpush.msra.mxu2 %v237_v16  ;;  %v286_v34 = vperm.slane %v284_v31, 0  ;;  %s413_s8 = sshll.u32 %s560_s0, 4  ;;  %s414_s8 = int_to_ptr.vmem [resolvable:$true] %s413_s8 }
   0xe   :  { %v282_v33 = vshrl.u32 %v281_v30, 7 }
  0x10   :  { %168 = vmatpush.bf16.msra.mxu0 %v466_v37  ;;  %479 = vmatpush.bf16.msra.mxu3 %v466_v37  ;;  %vm288_vm6 = vcmp.lt.s32.totalorder %v282_v33, %v286_v34 }
  0x11   :  { %502 = vrot.lane.b32.xlu1 %v501_v35, %s558_s15  ;;  %v283_v35 = vadd.s32 8, %v282_v33 }
  0x12   :  { %492 = vrot.lane.b32.xlu0 %v491_v36, %s558_s15  ;;  %v559_v36 = vmov 0  }
  0x13   :  { %506 = vset.pattern.permute.xlu2 %v559_v36  ;;  %508 = vset.pattern.permute.xlu1 %v559_v36  ;;  %vm289_vm7 = vcmp.lt.s32.totalorder %v283_v35, %v286_v34 }
  0x14   :  { %169 = vmatpush.bf16.msra.mxu0 %v465_v38  ;;  %480 = vmatpush.bf16.msra.mxu3 %v465_v38 }
  0x15   :  { %507 = vset.pattern.permute.xlu0 %v559_v36 }
  0x18   :  { %170 = vmatpush.bf16.msra.mxu0 %v464_v39  ;;  %481 = vmatpush.bf16.msra.mxu3 %v464_v39 }
  0x7b   :  { %v498_v40 = vpop.permute.xlu1 %497 }
  0x7c   :  { %v488_v41 = vpop.permute.xlu0 %487  ;;  %v500_v42 = vunpack.i.h.bf16 %v498_v40  ;;  %v499_v43 = vunpack.i.l.bf16 %v498_v40 }
  0x7d   :  { %v490_v44 = vunpack.i.h.bf16 %v488_v41  ;;  %v489_v45 = vunpack.i.l.bf16 %v488_v41 }
  0x7e   :  { %v96_v46 = vsel %vm92_vm2, %v612_v4, %v500_v42  ;;  %v95_v47 = vsel %vm92_vm2, %v610_v3, %v499_v43  ;;  %v285_v43 = vrot.slane %v284_v31, 1 }
  0x7f   :  { %v94_v54 = vsel %vm92_vm2, %v622_v9, %v490_v44  ;;  %v93_v55 = vsel %vm92_vm2, %v614_v6, %v489_v45 }
  0x83   :  { %v503_v48 = vpop.permute.xlu1 %502 }
  0x84   :  { %v505_v49 = vunpack.i.h.bf16 %v503_v48  ;;  %v504_v50 = vunpack.i.l.bf16 %v503_v48  ;;  %v493_v51 = vpop.permute.xlu0 %492 }
  0x85   :  { %v495_v52 = vunpack.i.h.bf16 %v493_v51  ;;  %v494_v53 = vunpack.i.l.bf16 %v493_v51 }
  0x86   :  { %v100_v56 = vsel %vm97_vm3, %v95_v47, %v504_v50  ;;  %v101_v57 = vsel %vm97_vm3, %v96_v46, %v505_v49  ;;  %v287_v47 = vperm.slane %v285_v43, 0 }
  0x87   :  { %v98_v58 = vsel %vm97_vm3, %v93_v55, %v494_v53  ;;  %v99_v59 = vsel %vm97_vm3, %v94_v54, %v495_v52  ;;  %v103_v60 = vpack.c.bf16 %v101_v57, %v100_v56 }
  0x88   :  { %v102_v61 = vpack.c.bf16 %v99_v59, %v98_v58  ;;  %vm290_vm9 = vcmp.lt.s32.totalorder %v282_v33, %v287_v47  ;;  %vm291_vm10 = vcmp.lt.s32.totalorder %v283_v35, %v287_v47 }
  0x89   :  { %449 = vmatmul.msk.bf16.vlgmr.msra.gmra.mxu3 %vm156_vm4, %v103_v60 }
  0x8a   :  { %448 = vmatmul.msk.bf16.vlgmr.msra.gmra.mxu0 %vm156_vm4, %v102_v61 }
 0x107   :  { %v172_v0 = vpop.f32.mrf.mxu0 }
 0x108   :  { %v672_v2 = vadd.f32 %v509_v1, %v172_v0 }
 0x10a   :  { %v182_v6 = vmax.f32 %v672_v2, 0.0 }
 0x10c   :  { %v177_v3 = vpop.f32.mrf.mxu3 }
 0x10d   :  { %v685_v11 = vadd.f32 %v509_v1, %v177_v3 }
 0x10f   :  { %v174_v4 = vpop.f32.mrf.mxu0  ;;  %v184_v13 = vmax.f32 %v685_v11, 0.0 }
 0x110   :  { %v674_v5 = vadd.f32 %v509_v1, %v174_v4 }
 0x112   :  { %v183_v7 = vmax.f32 %v674_v5, 0.0 }
 0x114   :  { %v186_v8 = vpack.c.bf16 %v183_v7, %v182_v6  ;;  %v179_v9 = vpop.f32.mrf.mxu3 }
 0x115   :  { %v683_v10 = vadd.f32 %v509_v1, %v179_v9 }
 0x116   :  { %458 = vmatmul.msk.bf16.vlgmr.msra.gmra.mxu1 %vm92_vm2, %v186_v8 }
 0x117   :  { %v185_v12 = vmax.f32 %v683_v10, 0.0 }
 0x119   :  { %v187_v14 = vpack.c.bf16 %v185_v12, %v184_v13 }
 0x126   :  { %459 = vmatmul.msk.bf16.gmra.mxu1 %vm92_vm2, %v187_v14 }
 0x193   :  { %v223_v18 = vpop.f32.mrf.mxu1 }
 0x194   :  { %v224_v19 = vadd.f32 %v510_v17, %v223_v18 }
 0x196   :  { %511 = vtanh.f32 %v224_v19 }
 0x19b   :  { %v225_v20 = vpop.f32.mrf.mxu1 }
 0x19c   :  { %v512_v21 = vpop.eup %511  ;;  %v226_v22 = vadd.f32 %v510_v17, %v225_v20 }
 0x19d   :  { %460 = vmatmul.msk.f32.vlgmr.msra.gmra.mxu2 %vm239_vm5, %v512_v21 }
 0x19e   :  { %513 = vtanh.f32 %v226_v22 }
 0x1a3   :  { %v228_v23 = vpop.f32.mrf.mxu1 }
 0x1a4   :  { %v514_v24 = vpop.eup %513  ;;  %v229_v25 = vadd.f32 %v510_v17, %v228_v23 }
 0x1a5   :  { %461 = vmatmul.msk.f32.gmra.mxu2 %vm239_vm5, %v514_v24 }
 0x1a6   :  { %515 = vtanh.f32 %v229_v25 }
 0x1ab   :  { %v230_v26 = vpop.f32.mrf.mxu1 }
 0x1ac   :  { %v516_v27 = vpop.eup %515  ;;  %v231_v28 = vadd.f32 %v510_v17, %v230_v26 }
 0x1ad   :  { %462 = vmatmul.msk.f32.gmra.mxu2 %vm239_vm5, %v516_v27 }
 0x1ae   :  { %517 = vtanh.f32 %v231_v28 }
 0x1b4   :  { %v518_v29 = vpop.eup %517 }
 0x1b5   :  { %463 = vmatmul.msk.f32.gmra.mxu2 %vm239_vm5, %v518_v29 }
 0x220   :  { %v269_v32 = vpop.f32.mrf.mxu2 }
 0x221   :  { %v292_v37 = vsel %vm288_vm6, %v269_v32, -1e+30 }
 0x222   :  { %v297_v40 = vsel %vm296_vm8, %v292_v37, -inf }
 0x228   :  { %v272_v38 = vpop.f32.mrf.mxu2 }
 0x229   :  { %v293_v39 = vsel %vm289_vm7, %v272_v38, -1e+30 }
 0x22a   :  { %v298_v41 = vsel %vm296_vm8, %v293_v39, -inf }
 0x22b   :  { %v299_v42 = vmax.f32 %v297_v40, %v298_v41 }
 0x22d   :  { %v300_v44 = vrot.slane %v299_v42, 4 }
 0x22f   :  { %v301_v45 = vmax.f32 %v299_v42, %v300_v44 }
 0x230   :  { %v275_v46 = vpop.f32.mrf.mxu2 }
 0x231   :  { %v302_v48 = vrot.slane %v301_v45, 2  ;;  %v294_v52 = vsel %vm290_vm9, %v275_v46, -1e+30 }
 0x232   :  { %v306_v57 = vsel %vm296_vm8, %v294_v52, -inf }
 0x233   :  { %v303_v49 = vmax.f32 %v301_v45, %v302_v48 }
 0x235   :  { %v304_v50 = vrot.slane %v303_v49, 1 }
 0x237   :  { %v305_v51 = vmax.f32 %v303_v49, %v304_v50 }
 0x238   :  { %v278_v53 = vpop.f32.mrf.mxu2 }
 0x239   :  { %v315_v54 = vsub.f32 %v292_v37, %v305_v51  ;;  %v316_v55 = vsub.f32 %v293_v39, %v305_v51  ;;  %v295_v56 = vsel %vm291_vm10, %v278_v53, -1e+30 }
 0x23a   :  { %v307_v58 = vsel %vm296_vm8, %v295_v56, -inf }
 0x23b   :  { %v319_v59 = vmul.f32 1.442695, %v315_v54  ;;  %v321_v60 = vmul.f32 1.442695, %v316_v55  ;;  %v308_v61 = vmax.f32 %v306_v57, %v307_v58 }
 0x23d   :  { %519 = vpow2.f32 %v321_v60  ;;  %v309_v62 = vrot.slane %v308_v61, 4 }
 0x23e   :  { %521 = vpow2.f32 %v319_v59 }
 0x23f   :  { %v310_v63 = vmax.f32 %v308_v61, %v309_v62 }
 0x241   :  { %v311_v0 = vrot.slane %v310_v63, 2 }
 0x243   :  { %v520_v1 = vpop.eup %519  ;;  %v312_v3 = vmax.f32 %v310_v63, %v311_v0 }
 0x244   :  { %v522_v4 = vpop.eup %521  ;;  %v370_v8 = vsel %vm296_vm8, %v520_v1, 0.0 }
 0x245   :  { %v313_v9 = vrot.slane %v312_v3, 1  ;;  %329 = vperm.xlu2 %506, %v522_v4   ;;  %v369_v14 = vsel %vm296_vm8, %v522_v4, 0.0 }
 0x246   :  { %v371_v15 = vadd.f32 %v370_v8, %v369_v14 }
 0x247   :  { %v314_v16 = vmax.f32 %v312_v3, %v313_v9 }
 0x248   :  { %v372_v17 = vrot.slane %v371_v15, 4 }
 0x249   :  { %v317_v18 = vsub.f32 %v294_v52, %v314_v16  ;;  %v318_v19 = vsub.f32 %v295_v56, %v314_v16 }
 0x24a   :  { %v373_v20 = vadd.f32 %v372_v17, %v371_v15 }
 0x24b   :  { %v323_v21 = vmul.f32 1.442695, %v317_v18  ;;  %v325_v22 = vmul.f32 1.442695, %v318_v19 }
 0x24c   :  { %v374_v23 = vrot.slane %v373_v20, 2 }
 0x24d   :  { %523 = vpow2.f32 %v323_v21  ;;  %334 = vperm.xlu2 %506, %v520_v1  }
 0x24e   :  { %525 = vpow2.f32 %v325_v22  ;;  %v375_v24 = vadd.f32 %v374_v23, %v373_v20 }
 0x250   :  { %v376_v25 = vrot.slane %v375_v24, 1 }
 0x252   :  { %v377_v26 = vadd.f32 %v376_v25, %v375_v24 }
 0x253   :  { %v524_v27 = vpop.eup %523 }
 0x254   :  { %v526_v28 = vpop.eup %525  ;;  %v378_v29 = vsel %vm296_vm8, %v524_v27, 0.0  ;;  %339 = vperm.xlu0 %507, %v524_v27   ;;  %527 = vrcp.f32 %v377_v26 }
 0x255   :  { %v379_v30 = vsel %vm296_vm8, %v526_v28, 0.0  ;;  %344 = vperm.xlu1 %508, %v526_v28  }
 0x256   :  { %v380_v31 = vadd.f32 %v379_v30, %v378_v29 }
 0x258   :  { %v381_v32 = vrot.slane %v380_v31, 4 }
 0x25a   :  { %v528_v33 = vpop.eup %527  ;;  %v382_v34 = vadd.f32 %v381_v32, %v380_v31 }
 0x25b   :  { %391 = vperm.xlu2 %506, %v528_v33  }
 0x25c   :  { %v383_v35 = vrot.slane %v382_v34, 2 }
 0x25e   :  { %v384_v36 = vadd.f32 %v383_v35, %v382_v34 }
 0x260   :  { %v385_v37 = vrot.slane %v384_v36, 1 }
 0x262   :  { %v386_v38 = vadd.f32 %v385_v37, %v384_v36 }
 0x264   :  { %529 = vrcp.f32 %v386_v38 }
 0x26a   :  { %v530_v39 = vpop.eup %529 }
 0x26b   :  { %396 = vperm.xlu1 %508, %v530_v39  }
 0x29f   :  { %v330_v40 = vpop.permute.xlu2 %329 }
 0x2a0   :  { %v347_v43 = vmul.f32 %v330_v40, %v182_v6 }
 0x2a2   :  { %v351_v45 = vsel %vm92_vm2, %v347_v43, 0.0 }
 0x2a7   :  { %v335_v41 = vpop.permute.xlu2 %334 }
 0x2a8   :  { %v348_v42 = vmul.f32 %v335_v41, %v183_v7 }
 0x2aa   :  { %v352_v44 = vsel %vm92_vm2, %v348_v42, 0.0 }
 0x2ab   :  { %v353_v46 = vadd.f32 %v352_v44, %v351_v45 }
 0x2ad   :  { %v354_v47 = vrot.slane %v353_v46, 4 }
 0x2af   :  { %v355_v7 = vadd.f32 %v354_v47, %v353_v46 }
 0x2b1   :  { %v356_v53 = vrot.slane %v355_v7, 2 }
 0x2b3   :  { %v357_v56 = vadd.f32 %v356_v53, %v355_v7 }
 0x2b5   :  { %v358_v58 = vrot.slane %v357_v56, 1  ;;  %v392_v10 = vpop.permute.xlu2 %391 }
 0x2b7   :  { %v359_v60 = vadd.f32 %v358_v58, %v357_v56 }
 0x2c6   :  { %v340_v48 = vpop.permute.xlu0 %339 }
 0x2c7   :  { %v345_v49 = vpop.permute.xlu1 %344  ;;  %v349_v50 = vmul.f32 %v340_v48, %v184_v13  ;;  %v399_v13 = vmul.f32 %v392_v10, %v359_v60 }
 0x2c8   :  { %v350_v51 = vmul.f32 %v345_v49, %v185_v12 }
 0x2c9   :  { %v360_v5 = vsel %vm92_vm2, %v349_v50, 0.0 }
 0x2ca   :  { %v361_v2 = vsel %vm92_vm2, %v350_v51, 0.0 }
 0x2cb   :  { %v362_v6 = vadd.f32 %v361_v2, %v360_v5 }
 0x2cd   :  { %v363_v52 = vrot.slane %v362_v6, 4 }
 0x2cf   :  { %v364_v54 = vadd.f32 %v363_v52, %v362_v6 }
 0x2d1   :  { %v365_v55 = vrot.slane %v364_v54, 2 }
 0x2d3   :  { %v366_v57 = vadd.f32 %v365_v55, %v364_v54 }
 0x2d5   :  { %v367_v59 = vrot.slane %v366_v57, 1 }
 0x2d7   :  { %v368_v11 = vadd.f32 %v367_v59, %v366_v57 }
 0x2dd   :  { %v397_v12 = vpop.permute.xlu1 %396 }
 0x2de   :  { %v400_v61 = vmul.f32 %v397_v12, %v368_v11 }
 0x2e0   :  { %v404_v62 = vsel %vm403_vm11, %v400_v61, %v399_v13 }
 0x2e1   :  { %407 = vst.msk [vmem:[#allocation2] sm:$0x3] %vm406_vm12, %v404_v62 }
 0x2e2   :  { %418 = dma.vmem_to_hbm [thread:$0]  %s414_s8, 32, %s416_s11, [#allocation3]  }
 0x2e3   :  { %555 = dma.done.wait [#allocation3], 32  }
 0x2e4   :  { %556 = vsyncadd [#allocation3], 4294967264 }
 0x2e5   :  { %423 = vsyncpa [#allocation3], 1 }

</bundles_post_ra>
